<compile_context>
chip_gen: v5e
topology: v5e:2x2
jax: 0.10.0
libtpu: 0.0.40
codegen_flags: <defaults>
</compile_context>

<pallas_src>
import functools

import jax
import jax.numpy as jnp
from jax.experimental import pallas as pl
from jax.experimental.pallas import tpu as pltpu


def ama_kernel(alpha_ref,
               x_ref,
               w_e1, b_e1, w_e2, b_e2,
               w_dp, b_dp,            # fused [decoder-1 | pred] weights/bias, width 2*H
               w_d2, b_d2,            # decoder-2 weights/bias, lane-padded to DP
               out_ref,               # (TB, H)  lane-dense pred slab, column 0 = prediction
               recon_ref):            # (TB, DP) lane-dense reconstruction (first D cols valid)
    """One batch tile of the forward pass; all matmuls in bf16 on the MXU, f32 accumulate."""
    alpha = alpha_ref[0]              # shared PReLU parameter (scalar, SMEM), read once

    def prelu(v):
        return jnp.where(v >= 0, v, alpha * v)

    H = w_dp.shape[0]                 # 128

    x = x_ref[...]                    # bf16 (TB, D_in)

    # ---- encoders ----
    h = prelu(jnp.dot(x, w_e1[...], preferred_element_type=jnp.float32) + b_e1[...])
    h = prelu(jnp.dot(h.astype(jnp.bfloat16), w_e2[...],
                      preferred_element_type=jnp.float32) + b_e2[...])
    hb = h.astype(jnp.bfloat16)

    # ---- fused decoder-1 + preds (single 256-wide MXU pass) ----
    # columns [0:H)   -> PReLU(Linear(128,128)) of the decoder
    # column  H       -> PReLU(Linear(128,1)) final prediction
    # columns (H:2H)  -> zero weights/bias  => PReLU(0) = 0
    dp = prelu(jnp.dot(hb, w_dp[...], preferred_element_type=jnp.float32) + b_dp[...])
    d = dp[:, :H]                     # decoder hidden (128-lane aligned slice)
    out_ref[...] = dp[:, H:]          # unmasked 128-wide store; col 0 is the prediction

    # ---- decoder-2 (reconstruction, lane-padded to DP) ----
    recon_ref[...] = prelu(
        jnp.dot(d.astype(jnp.bfloat16), w_d2[...],
                preferred_element_type=jnp.float32) + b_d2[...])


def init_linear(key, in_dim, out_dim):
    """PyTorch-style nn.Linear init (uniform +/-1/sqrt(in_dim)), returned as (in,out)/(1,out)."""
    kw, kb = jax.random.split(key)
    bound = 1.0 / jnp.sqrt(jnp.float32(in_dim))
    w = jax.random.uniform(kw, (in_dim, out_dim), jnp.float32, -bound, bound)
    b = jax.random.uniform(kb, (1, out_dim), jnp.float32, -bound, bound)
    return w, b


def pack_params(params):
    """One-time packing: bf16 weights, fuse [w_d1 | w_p] into a lane-dense 2*H RHS,
    lane-pad decoder-2 output to a multiple of 128 (padded columns zeroed)."""
    (alpha, w_e1, b_e1, w_e2, b_e2, w_d1, b_d1, w_d2, b_d2, w_p, b_p) = params
    H = w_d1.shape[0]                          # 128
    D = w_d2.shape[1]                          # 156
    DP = pl.cdiv(D, 128) * 128                 # 256

    w_dp = jnp.zeros((H, 2 * H), jnp.float32)
    w_dp = w_dp.at[:, :H].set(w_d1).at[:, H:H + 1].set(w_p)
    b_dp = jnp.zeros((1, 2 * H), jnp.float32)
    b_dp = b_dp.at[:, :H].set(b_d1).at[:, H:H + 1].set(b_p)

    w_d2p = jnp.zeros((H, DP), jnp.float32).at[:, :D].set(w_d2)
    b_d2p = jnp.zeros((1, DP), jnp.float32).at[:, :D].set(b_d2)

    bf16 = jnp.bfloat16
    return (alpha.astype(jnp.float32),
            w_e1.astype(bf16), b_e1.astype(jnp.float32),
            w_e2.astype(bf16), b_e2.astype(jnp.float32),
            w_dp.astype(bf16), b_dp.astype(jnp.float32),
            w_d2p.astype(bf16), b_d2p.astype(jnp.float32))


@functools.partial(jax.jit, static_argnames=("block_rows",))
def aimeetsai_ae_forward(features, packed, block_rows=512):
    """Launches the batch-tiled Pallas kernel and assembles the same result dict
    structure as the PyTorch module. `block_rows` = batch rows per grid step."""
    B, D = features.shape
    (alpha, w_e1, b_e1, w_e2, b_e2, w_dp, b_dp, w_d2p, b_d2p) = packed
    H = w_e2.shape[0]                          # 128
    DP = w_d2p.shape[1]                        # 256 (lane-padded recon width)

    # Batch tile: multiple of 8 sublanes, capped at block_rows.
    TB = min(block_rows, pl.cdiv(B, 8) * 8)
    Bp = pl.cdiv(B, TB) * TB

    x = features.astype(jnp.bfloat16)
    if Bp != B:
        x = jnp.pad(x, ((0, Bp - B), (0, 0)))

    def batch_map(i):
        return (i, 0)

    def const_spec(arr):
        # Full-array block with a constant index_map -> stays VMEM-resident across steps.
        return pl.BlockSpec(arr.shape, lambda i: (0,) * arr.ndim)

    smem_spec = pl.BlockSpec(memory_space=pltpu.MemorySpace.SMEM)

    out_slab, recon_pad = pl.pallas_call(
        ama_kernel,
        out_shape=(
            jax.ShapeDtypeStruct((Bp, H), jnp.float32),    # pred slab (col 0 = output)
            jax.ShapeDtypeStruct((Bp, DP), jnp.float32),   # lane-padded reconstruction
        ),
        grid=(Bp // TB,),
        in_specs=[smem_spec,
                  pl.BlockSpec((TB, D), batch_map),
                  const_spec(w_e1), const_spec(b_e1),
                  const_spec(w_e2), const_spec(b_e2),
                  const_spec(w_dp), const_spec(b_dp),
                  const_spec(w_d2p), const_spec(b_d2p)],
        out_specs=(pl.BlockSpec((TB, H), batch_map),
                   pl.BlockSpec((TB, DP), batch_map)),
        compiler_params=pltpu.CompilerParams(
            dimension_semantics=("parallel",)),
    )(alpha, x, w_e1, b_e1, w_e2, b_e2, w_dp, b_dp, w_d2p, b_d2p)

    out = out_slab[:B, :1]
    recon = recon_pad[:B, :D]
    return {
        "output": out,
        "uncertainty": {"index_query": (features, recon)},
    }


def reference_forward(features, params):
    """Pure-JAX reference mirroring the kernel's bf16-operand / f32-accumulate math."""
    (alpha, w_e1, b_e1, w_e2, b_e2, w_d1, b_d1, w_d2, b_d2, w_p, b_p) = params
    a = alpha[0]
    prelu = lambda v: jnp.where(v >= 0, v, a * v)
    bf = lambda t: t.astype(jnp.bfloat16).astype(jnp.float32)
    dot = lambda l, r: jnp.dot(bf(l), bf(r), precision=jax.lax.Precision.HIGHEST)
    h = prelu(dot(features, w_e1) + b_e1)
    h = prelu(dot(h, w_e2) + b_e2)
    d = prelu(dot(h, w_d1) + b_d1)
    recon = prelu(dot(d, w_d2) + b_d2)
    out = prelu(dot(h, w_p) + b_p)
    return out, recon


if __name__ == "__main__":
    INPUT_DIMS = 156
    H1, H2 = 128, 128
    B = 16              # small demo batch
    BLOCK_ROWS = 8      # small tile so the batch grid (2 steps) is actually exercised

    key = jax.random.PRNGKey(0)
    keys = jax.random.split(key, 7)

    # Deterministic parameter init (shapes per nn.Linear in the module).
    w_e1, b_e1 = init_linear(keys[0], INPUT_DIMS, H1)   # encoders[0]: Linear(156,128)
    w_e2, b_e2 = init_linear(keys[1], H1, H2)           # encoders[3]: Linear(128,128)
    w_d1, b_d1 = init_linear(keys[2], H2, H1)           # decoders[0]: Linear(128,128)
    w_d2, b_d2 = init_linear(keys[3], H1, INPUT_DIMS)   # decoders[3]: Linear(128,156)
    w_p, b_p = init_linear(keys[4], H2, 1)              # preds[0]:    Linear(128,1)
    alpha = jnp.full((1,), 0.25, jnp.float32)           # shared nn.PReLU() weight

    params = (alpha, w_e1, b_e1, w_e2, b_e2, w_d1, b_d1, w_d2, b_d2, w_p, b_p)
    packed = pack_params(params)

    features = jax.random.normal(keys[5], (B, INPUT_DIMS), jnp.float32)

    result = aimeetsai_ae_forward(features, packed, block_rows=BLOCK_ROWS)
    jax.block_until_ready(result)

    # Sanity check against pure-JAX reference (bf16 operands, f32 accumulate).
    ref_out, ref_recon = reference_forward(features, params)
    assert jnp.allclose(result["output"], ref_out, atol=1e-2, rtol=1e-2)
    assert jnp.allclose(result["uncertainty"]["index_query"][1], ref_recon,
                        atol=1e-2, rtol=1e-2)
    assert result["output"].shape == (B, 1)
    assert result["uncertainty"]["index_query"][0].shape == (B, INPUT_DIMS)
    assert result["uncertainty"]["index_query"][1].shape == (B, INPUT_DIMS)

    print("KERNEL_OK")
</pallas_src>

<mosaic_0001>
module attributes {stable_mosaic.version = 11 : i64} {
  func.func @ama_kernel(%arg0: i32, %arg1: memref<1xf32, #tpu.memory_space<smem>>, %arg2: memref<8x156xbf16, #tpu.memory_space<vmem>>, %arg3: memref<156x128xbf16, #tpu.memory_space<vmem>>, %arg4: memref<1x128xf32, #tpu.memory_space<vmem>>, %arg5: memref<128x128xbf16, #tpu.memory_space<vmem>>, %arg6: memref<1x128xf32, #tpu.memory_space<vmem>>, %arg7: memref<128x256xbf16, #tpu.memory_space<vmem>>, %arg8: memref<1x256xf32, #tpu.memory_space<vmem>>, %arg9: memref<128x256xbf16, #tpu.memory_space<vmem>>, %arg10: memref<1x256xf32, #tpu.memory_space<vmem>>, %arg11: memref<8x128xf32, #tpu.memory_space<vmem>>, %arg12: memref<8x256xf32, #tpu.memory_space<vmem>>) attributes {dimension_semantics = [#tpu.dimension_semantics<parallel>], iteration_bounds = array<i64: 2>, scalar_prefetch = 0 : i64, scratch_operands = 0 : i64, tpu.core_type = #tpu.core_type<tc>, window_params = [{transform_indices = @transform_0, window_bounds = array<i64: 1>}, {transform_indices = @transform_1, window_bounds = array<i64: 8, 156>}, {pipeline_mode = #tpu.pipeline_mode<synchronous>, transform_indices = @transform_2, window_bounds = array<i64: 156, 128>}, {pipeline_mode = #tpu.pipeline_mode<synchronous>, transform_indices = @transform_3, window_bounds = array<i64: 1, 128>}, {pipeline_mode = #tpu.pipeline_mode<synchronous>, transform_indices = @transform_4, window_bounds = array<i64: 128, 128>}, {pipeline_mode = #tpu.pipeline_mode<synchronous>, transform_indices = @transform_5, window_bounds = array<i64: 1, 128>}, {pipeline_mode = #tpu.pipeline_mode<synchronous>, transform_indices = @transform_6, window_bounds = array<i64: 128, 256>}, {pipeline_mode = #tpu.pipeline_mode<synchronous>, transform_indices = @transform_7, window_bounds = array<i64: 1, 256>}, {pipeline_mode = #tpu.pipeline_mode<synchronous>, transform_indices = @transform_8, window_bounds = array<i64: 128, 256>}, {pipeline_mode = #tpu.pipeline_mode<synchronous>, transform_indices = @transform_9, window_bounds = array<i64: 1, 256>}, {transform_indices = @transform_10, window_bounds = array<i64: 8, 128>}, {transform_indices = @transform_11, window_bounds = array<i64: 8, 256>}]} {
    %c0 = arith.constant 0 : index
    %0 = memref.load %arg1[%c0] : memref<1xf32, #tpu.memory_space<smem>>
    %c0_0 = arith.constant 0 : index
    %c0_1 = arith.constant 0 : index
    %1 = vector.load %arg2[%c0_0, %c0_1] : memref<8x156xbf16, #tpu.memory_space<vmem>>, vector<8x156xbf16>
    %c0_2 = arith.constant 0 : index
    %c0_3 = arith.constant 0 : index
    %2 = vector.load %arg3[%c0_2, %c0_3] : memref<156x128xbf16, #tpu.memory_space<vmem>>, vector<156x128xbf16>
    %cst = arith.constant dense<0.000000e+00> : vector<8x128xf32>
    %3 = tpu.matmul %1, %2, %cst {dimension_numbers = #tpu.dot_dimension_numbers<[1], [0], [0], [1], [0, 0, 1, 1], [], []>} : vector<8x156xbf16>, vector<156x128xbf16>, vector<8x128xf32> -> vector<8x128xf32>
    %c0_4 = arith.constant 0 : index
    %c0_5 = arith.constant 0 : index
    %4 = vector.load %arg4[%c0_4, %c0_5] : memref<1x128xf32, #tpu.memory_space<vmem>>, vector<1x128xf32>
    %5 = vector.broadcast %4 : vector<1x128xf32> to vector<8x128xf32>
    %6 = arith.addf %3, %5 : vector<8x128xf32>
    %cst_6 = arith.constant 0.000000e+00 : f32
    %7 = vector.broadcast %cst_6 : f32 to vector<8x128xf32>
    %8 = arith.cmpf oge, %6, %7 : vector<8x128xf32>
    %9 = vector.broadcast %0 : f32 to vector<8x128xf32>
    %10 = arith.mulf %9, %6 : vector<8x128xf32>
    %11 = arith.select %8, %6, %10 : vector<8x128xi1>, vector<8x128xf32>
    %12 = arith.truncf %11 : vector<8x128xf32> to vector<8x128xbf16>
    %c0_7 = arith.constant 0 : index
    %c0_8 = arith.constant 0 : index
    %13 = vector.load %arg5[%c0_7, %c0_8] : memref<128x128xbf16, #tpu.memory_space<vmem>>, vector<128x128xbf16>
    %cst_9 = arith.constant dense<0.000000e+00> : vector<8x128xf32>
    %14 = tpu.matmul %12, %13, %cst_9 {dimension_numbers = #tpu.dot_dimension_numbers<[1], [0], [0], [1], [0, 0, 1, 1], [], []>} : vector<8x128xbf16>, vector<128x128xbf16>, vector<8x128xf32> -> vector<8x128xf32>
    %c0_10 = arith.constant 0 : index
    %c0_11 = arith.constant 0 : index
    %15 = vector.load %arg6[%c0_10, %c0_11] : memref<1x128xf32, #tpu.memory_space<vmem>>, vector<1x128xf32>
    %16 = vector.broadcast %15 : vector<1x128xf32> to vector<8x128xf32>
    %17 = arith.addf %14, %16 : vector<8x128xf32>
    %cst_12 = arith.constant 0.000000e+00 : f32
    %18 = vector.broadcast %cst_12 : f32 to vector<8x128xf32>
    %19 = arith.cmpf oge, %17, %18 : vector<8x128xf32>
    %20 = vector.broadcast %0 : f32 to vector<8x128xf32>
    %21 = arith.mulf %20, %17 : vector<8x128xf32>
    %22 = arith.select %19, %17, %21 : vector<8x128xi1>, vector<8x128xf32>
    %23 = arith.truncf %22 : vector<8x128xf32> to vector<8x128xbf16>
    %c0_13 = arith.constant 0 : index
    %c0_14 = arith.constant 0 : index
    %24 = vector.load %arg7[%c0_13, %c0_14] : memref<128x256xbf16, #tpu.memory_space<vmem>>, vector<128x256xbf16>
    %cst_15 = arith.constant dense<0.000000e+00> : vector<8x256xf32>
    %25 = tpu.matmul %23, %24, %cst_15 {dimension_numbers = #tpu.dot_dimension_numbers<[1], [0], [0], [1], [0, 0, 1, 1], [], []>} : vector<8x128xbf16>, vector<128x256xbf16>, vector<8x256xf32> -> vector<8x256xf32>
    %c0_16 = arith.constant 0 : index
    %c0_17 = arith.constant 0 : index
    %26 = vector.load %arg8[%c0_16, %c0_17] : memref<1x256xf32, #tpu.memory_space<vmem>>, vector<1x256xf32>
    %27 = vector.broadcast %26 : vector<1x256xf32> to vector<8x256xf32>
    %28 = arith.addf %25, %27 : vector<8x256xf32>
    %cst_18 = arith.constant 0.000000e+00 : f32
    %29 = vector.broadcast %cst_18 : f32 to vector<8x256xf32>
    %30 = arith.cmpf oge, %28, %29 : vector<8x256xf32>
    %31 = vector.broadcast %0 : f32 to vector<8x256xf32>
    %32 = arith.mulf %31, %28 : vector<8x256xf32>
    %33 = arith.select %30, %28, %32 : vector<8x256xi1>, vector<8x256xf32>
    %34 = vector.extract_strided_slice %33 {offsets = [0, 0], sizes = [8, 128], strides = [1, 1]} : vector<8x256xf32> to vector<8x128xf32>
    %35 = vector.extract_strided_slice %33 {offsets = [0, 128], sizes = [8, 128], strides = [1, 1]} : vector<8x256xf32> to vector<8x128xf32>
    %c0_19 = arith.constant 0 : index
    %c0_20 = arith.constant 0 : index
    %36 = vector.load %arg11[%c0_19, %c0_20] : memref<8x128xf32, #tpu.memory_space<vmem>>, vector<8x128xf32>
    tpu.vector_store %arg11[%c0_19, %c0_20], %35 {strides = array<i32>} : memref<8x128xf32, #tpu.memory_space<vmem>>, vector<8x128xf32>,
    %37 = arith.truncf %34 : vector<8x128xf32> to vector<8x128xbf16>
    %c0_21 = arith.constant 0 : index
    %c0_22 = arith.constant 0 : index
    %38 = vector.load %arg9[%c0_21, %c0_22] : memref<128x256xbf16, #tpu.memory_space<vmem>>, vector<128x256xbf16>
    %cst_23 = arith.constant dense<0.000000e+00> : vector<8x256xf32>
    %39 = tpu.matmul %37, %38, %cst_23 {dimension_numbers = #tpu.dot_dimension_numbers<[1], [0], [0], [1], [0, 0, 1, 1], [], []>} : vector<8x128xbf16>, vector<128x256xbf16>, vector<8x256xf32> -> vector<8x256xf32>
    %c0_24 = arith.constant 0 : index
    %c0_25 = arith.constant 0 : index
    %40 = vector.load %arg10[%c0_24, %c0_25] : memref<1x256xf32, #tpu.memory_space<vmem>>, vector<1x256xf32>
    %41 = vector.broadcast %40 : vector<1x256xf32> to vector<8x256xf32>
    %42 = arith.addf %39, %41 : vector<8x256xf32>
    %cst_26 = arith.constant 0.000000e+00 : f32
    %43 = vector.broadcast %cst_26 : f32 to vector<8x256xf32>
    %44 = arith.cmpf oge, %42, %43 : vector<8x256xf32>
    %45 = vector.broadcast %0 : f32 to vector<8x256xf32>
    %46 = arith.mulf %45, %42 : vector<8x256xf32>
    %47 = arith.select %44, %42, %46 : vector<8x256xi1>, vector<8x256xf32>
    %c0_27 = arith.constant 0 : index
    %c0_28 = arith.constant 0 : index
    %48 = vector.load %arg12[%c0_27, %c0_28] : memref<8x256xf32, #tpu.memory_space<vmem>>, vector<8x256xf32>
    tpu.vector_store %arg12[%c0_27, %c0_28], %47 {strides = array<i32>} : memref<8x256xf32, #tpu.memory_space<vmem>>, vector<8x256xf32>,
    return
  }
  func.func @transform_0(%arg0: i32) -> i32 {
    %c0_i32 = arith.constant 0 : i32
    %c0_i32_0 = arith.constant 0 : i32
    return %c0_i32 : i32
  }
  func.func @transform_1(%arg0: i32) -> (i32, i32) {
    %c0_i32 = arith.constant 0 : i32
    %c0_i32_0 = arith.constant 0 : i32
    return %arg0, %c0_i32 : i32, i32
  }
  func.func @transform_2(%arg0: i32) -> (i32, i32) {
    %c0_i32 = arith.constant 0 : i32
    %c0_i32_0 = arith.constant 0 : i32
    %c0_i32_1 = arith.constant 0 : i32
    return %c0_i32, %c0_i32_0 : i32, i32
  }
  func.func @transform_3(%arg0: i32) -> (i32, i32) {
    %c0_i32 = arith.constant 0 : i32
    %c0_i32_0 = arith.constant 0 : i32
    %c0_i32_1 = arith.constant 0 : i32
    return %c0_i32, %c0_i32_0 : i32, i32
  }
  func.func @transform_4(%arg0: i32) -> (i32, i32) {
    %c0_i32 = arith.constant 0 : i32
    %c0_i32_0 = arith.constant 0 : i32
    %c0_i32_1 = arith.constant 0 : i32
    return %c0_i32, %c0_i32_0 : i32, i32
  }
  func.func @transform_5(%arg0: i32) -> (i32, i32) {
    %c0_i32 = arith.constant 0 : i32
    %c0_i32_0 = arith.constant 0 : i32
    %c0_i32_1 = arith.constant 0 : i32
    return %c0_i32, %c0_i32_0 : i32, i32
  }
  func.func @transform_6(%arg0: i32) -> (i32, i32) {
    %c0_i32 = arith.constant 0 : i32
    %c0_i32_0 = arith.constant 0 : i32
    %c0_i32_1 = arith.constant 0 : i32
    return %c0_i32, %c0_i32_0 : i32, i32
  }
  func.func @transform_7(%arg0: i32) -> (i32, i32) {
    %c0_i32 = arith.constant 0 : i32
    %c0_i32_0 = arith.constant 0 : i32
    %c0_i32_1 = arith.constant 0 : i32
    return %c0_i32, %c0_i32_0 : i32, i32
  }
  func.func @transform_8(%arg0: i32) -> (i32, i32) {
    %c0_i32 = arith.constant 0 : i32
    %c0_i32_0 = arith.constant 0 : i32
    %c0_i32_1 = arith.constant 0 : i32
    return %c0_i32, %c0_i32_0 : i32, i32
  }
  func.func @transform_9(%arg0: i32) -> (i32, i32) {
    %c0_i32 = arith.constant 0 : i32
    %c0_i32_0 = arith.constant 0 : i32
    %c0_i32_1 = arith.constant 0 : i32
    return %c0_i32, %c0_i32_0 : i32, i32
  }
  func.func @transform_10(%arg0: i32) -> (i32, i32) {
    %c0_i32 = arith.constant 0 : i32
    %c0_i32_0 = arith.constant 0 : i32
    return %arg0, %c0_i32 : i32, i32
  }
  func.func @transform_11(%arg0: i32) -> (i32, i32) {
    %c0_i32 = arith.constant 0 : i32
    %c0_i32_0 = arith.constant 0 : i32
    return %arg0, %c0_i32 : i32, i32
  }
}

</mosaic_0001>

<bundles_post_ra>
// kernel: aimeetsai_ae_forward.1
= control target key start
LH: loop header
LB: loop body
LE: loop exit
PB: predicated region body
PF: predicated region fallthrough
CT: control target
= control target key end

     0   :  { %s1889_s0 = inlined_call_operand.<no memory space> [shape: f32[1], index: 0, kind: input, shape index: {}]   ;;  %s1890_s1 = inlined_call_operand.vmem [shape: bf16[16,156], index: 1, kind: input, shape index: {}]   ;;  %s1891_s2 = inlined_call_operand.hbm [shape: bf16[156,128], index: 2, kind: input, shape index: {}]   ;;  %s1892_s3 = inlined_call_operand.vmem [shape: f32[1,128], index: 3, kind: input, shape index: {}]   ;;  %s1893_s4 = inlined_call_operand.hbm [shape: bf16[128,128], index: 4, kind: input, shape index: {}]   ;;  %s1894_s5 = inlined_call_operand.vmem [shape: f32[1,128], index: 5, kind: input, shape index: {}]   ;;  %s1895_s6 = inlined_call_operand.hbm [shape: bf16[128,256], index: 6, kind: input, shape index: {}]   ;;  %s1896_s7 = inlined_call_operand.vmem [shape: f32[1,256], index: 7, kind: input, shape index: {}]   ;;  %s1897_s8 = inlined_call_operand.hbm [shape: bf16[128,256], index: 8, kind: input, shape index: {}]   ;;  %s1898_s9 = inlined_call_operand.vmem [shape: f32[1,256], index: 9, kind: input, shape index: {}]   ;;  %s1899_s10 = inlined_call_operand.vmem [shape: f32[16,128], index: 10, kind: output, shape index: {0}]   ;;  %s1900_s11 = inlined_call_operand.hbm [shape: f32[16,256], index: 11, kind: output, shape index: {1}]  }
   0x1   :  { %1906 = sst [smem:[#allocation21_spill]] %s1891_s2 }
   0x2   :  { %1907 = sst [smem:[#allocation22_spill]] %s1893_s4 }
   0x3   :  { %17 = sst [smem:[#allocation2]] %s1889_s0 }
   0x4   :  { %18 = vsyncpa [#allocation4], 0 }
   0x5   :  { %19 = vsyncpa [#allocation7], 0 }
   0x6   :  { %20 = vsyncpa [#allocation10], 0 }
   0x7   :  { %21 = vsyncpa [#allocation5], 0 }
   0x8   :  { %23 = vsyncpa [#allocation5 + $0x1], 0  ;;  %s1727_s19 = smov 0   ;;  %s1729_s20 = smov 0  }
   0x9   :  { %s1731_s21 = smov 0   ;;  %s1733_s22 = smov 0  }
   0xa LB: > { %1908 = sst [smem:[#allocation16_spill]] %s1642_s19  ;;  %s1748_s0 = sadd.s32 4294967295, %s1654_s22   ;;  %s1654_s22 = sphi %s1733_s22, %s1921_s22   ;;  %s1650_s21 = sphi %s1731_s21, %s1923_s21   ;;  %s1646_s20 = sphi %s1729_s20, %s1925_s20   ;;  %s1642_s19 = sphi %s1727_s19, %s1924_s19  }
   0xb   : > { %1909 = sst [smem:[#allocation17_spill]] %s1650_s21  ;;  %s1100_s23 = sadd.s32 4294967294, %s1654_s22  }
   0xc   : > { %s1752_s24 = sadd.s32 1, %s1654_s22   ;;  %s277_s25 = sadd.s32 1, %s1650_s21 }
   0xd   : > { %1910 = sst [smem:[#allocation18_spill]] %s1752_s24  ;;  %s274_s26 = ssub.s32 %s1654_s22, %s1752_s24 }
   0xe   : > { %p287_p0 = scmp.ne.s32.totalorder %s1650_s21, %s1646_s20  ;;  %p275_p1 = scmp.eq.s32.totalorder %s274_s26, 0 }
   0xf   : > { %p288_p2 = scmp.eq.s32.totalorder %s1748_s0, 1  ;;  %p293_p3 = scmp.ne.s32.totalorder %s1646_s20, %s1642_s19 }
  0x10   : > { %p294_p4 = scmp.eq.s32.totalorder %s1100_s23, 1  ;;  %p1101_p7 = scmp.ge.s32.totalorder %s1654_s22, 1 }
  0x11   : > { %s1763_s27 = scalar_select %p275_p1, %s1650_s21, %s277_s25  }
  0x12   : > { %p1765_p5 = por %p288_p2, %p287_p0  ;;  %p1769_p6 = por %p294_p4, %p293_p3 }
  0x13   : > { %1911 = sst [smem:[#allocation19_spill]] %s1763_s27  ;;  %p301_p8 = scmp.lt.s32.totalorder %s1654_s22, 3 }
  0x14   : > { %s1913_s29 = scalar_select %p1769_p6, 1, 0 }
  0x15   : > { %p1409_p9 = scmp.eq.s32.totalorder %s1748_s0, 0  ;;  %p1776_p10 = pnand %p1101_p7, %p301_p8 }
  0x16   : > { %1914 = sst [smem:[#allocation20_spill]] %s1913_s29  ;;  %s1656_s23 = smov [#allocation6]  }
  0x17   : > { %s1916_s4 = sld [smem:[#allocation22_spill]]  ;;  %p1392_p11 = pneg %p1776_p10 }
  0x18   : > { %s1917_s2 = sld [smem:[#allocation21_spill]]  ;;  %s334_s25 = sshll.u32 %s1656_s23, 4  ;;  %s335_s25 = int_to_ptr.vmem [resolvable:$true] %s334_s25 }
  0x19   : > { %p1790_p12 = pnand %p1409_p9, %p1392_p11  ;;  %s1657_s26 = smov 64  }
  0x1a   : > { %s1658_s12 = smov 4   ;;  %s1659_s13 = smov [#allocation3]  }
  0x1b   : > { %s1660_s27 = smov [#allocation8]   ;;  %s366_s29 = sshll.u32 %s1897_s8, 4  ;;  %s367_s29 = int_to_ptr.hbm [resolvable:$true] %s366_s29 }
  0x1c   : > { %s351_s23 = sshll.u32 %s1660_s27, 4  ;;  %s1661_s19 = smov 128   ;;  %s352_s23 = int_to_ptr.vmem [resolvable:$true] %s351_s23 }
  0x1d   : > { %s332_s14 = sshll.u32 %s1916_s4, 4  ;;  %s317_s4 = sshll.u32 %s1659_s13, 4  ;;  %s333_s14 = int_to_ptr.hbm [resolvable:$true] %s332_s14  ;;  %s318_s4 = int_to_ptr.vmem [resolvable:$true] %s317_s4 }
  0x1e   : > { %s315_s17 = sshll.u32 %s1917_s2, 4  ;;  %s349_s2 = sshll.u32 %s1895_s6, 4  ;;  %s316_s17 = int_to_ptr.hbm [resolvable:$true] %s315_s17  ;;  %s350_s2 = int_to_ptr.hbm [resolvable:$true] %s349_s2 }
  0x1f   : > { %1398 = dma.hbm_to_vmem [thread:$0]  (!%p1790_p12), %s333_s14, 1024, %s335_s25, [#allocation7], %s1657_s26, %s1657_s26, %s1658_s12  }
  0x20   : > { %1395 = dma.hbm_to_vmem [thread:$0]  (!%p1790_p12), %s316_s17, 1280, %s318_s4, [#allocation4], %s1657_s26, %s1657_s26, %s1658_s12  }
  0x21   : > { %s1662_s14 = smov 8   ;;  %s1663_s25 = smov [#allocation9]  }
  0x22   : > { %1401 = dma.hbm_to_vmem [thread:$0]  (!%p1790_p12), %s350_s2, 2048, %s352_s23, [#allocation7], %s1661_s19, %s1661_s19, %s1662_s14  }
  0x23   : > { %s368_s13 = sshll.u32 %s1663_s25, 4  ;;  %395 = sbr.rel (%p1776_p10) target bundleno = 630 (0x276), region = 60  ;;  %s369_s13 = int_to_ptr.vmem [resolvable:$true] %s368_s13 }
  0x24   : > { %1404 = dma.hbm_to_vmem [thread:$0]  (!%p1790_p12), %s367_s29, 2048, %s369_s13, [#allocation10], %s1661_s19, %s1661_s19, %s1662_s14  }
  0x28   : > { %1625 = dma.done.wait (%p1409_p9), [#allocation4], 1280  }
  0x29   : > { %1627 = vsyncadd (%p1409_p9), [#allocation4], 4294966016 }
  0x2a   : > { %1629 = dma.done.wait (%p1409_p9), [#allocation7], 3072  }
  0x2b   : > { %1631 = vsyncadd (%p1409_p9), [#allocation7], 4294964224 }
  0x2c   : > { %1633 = dma.done.wait (%p1409_p9), [#allocation10], 2048  }
  0x2d   : > { %1635 = vsyncadd (%p1409_p9), [#allocation10], 4294965248  ;;  %p455_p13 = scmp.lt.s32.totalorder %s1748_s0, 1  ;;  %v1330_v0 = vld [vmem:[#allocation3 + $0x38] sm:$0xff]  ;;  %v1154_v1 = vld [vmem:[#allocation3 + $0x48] sm:$0xf] }
  0x2e   : > { %564 = vmatpush.bf16.msra.mxu0 %v1330_v0  ;;  %v1329_v2 = vld [vmem:[#allocation3 + $0x30] sm:$0xff]  ;;  %v1332_v3 = vld [vmem:[#allocation3 + $0x48] sm:$0x30]  ;;  %vm560_vm0 = vcmask 1045504   ;;  %v1331_v10 = vld [vmem:[#allocation3 + $0x40] sm:$0xff]  ;;  %vm556_vm1 = vcmask 228352  }
  0x2f   : > { %s1824_s2 = scalar_select %p455_p13, %s1748_s0, 1  ;;  %v1155_v4 = vor.u32 %v1332_v3, %v1154_v1  ;;  %v1340_v6 = vld [vmem:[#allocation6 + $0x38] sm:$0xff]  ;;  %v1339_v11 = vld [vmem:[#allocation6 + $0x30] sm:$0xff]  ;;  %v1338_v14 = vld [vmem:[#allocation6 + $0x28] sm:$0xff] }
  0x30   : > { %v1328_v9 = vld [vmem:[#allocation3 + $0x28] sm:$0xff]  ;;  %663 = vmatpush.bf16.msra.mxu2 %v1340_v6  ;;  %v1327_v13 = vld [vmem:[#allocation3 + $0x20] sm:$0xff]  ;;  %v1326_v15 = vld [vmem:[#allocation3 + $0x18] sm:$0xff]  ;;  %s465_s27 = sld [smem:[#allocation2]]  ;;  %s452_s13 = sand.u32 1, %s1646_s20  }
  0x31   : > { %s1322_s4 = sshll.u32 %s1824_s2, 3  ;;  %v562_v7 = vsel %vm560_vm0, %v1155_v4, 0  ;;  %v1337_v16 = vld [vmem:[#allocation6 + $0x20] sm:$0xff]  ;;  %v1324_v18 = vld [vmem:[#allocation3 + $0x8] sm:$0xff]  ;;  %v1323_v20 = vld [vmem:[#allocation3] sm:$0xff]  ;;  %s1112_s2 = sshll.u32 %s452_s13, 4 }
  0x32   : > { %s459_s24 = scalar_lea.vmem %s1890_s1, %s1322_s4  ;;  %565 = vmatpush.bf16.msra.mxu0 %v1329_v2  ;;  %583 = vmatpush.bf16.msra.mxu1 %v562_v7  ;;  %v1325_v17 = vld [vmem:[#allocation3 + $0x10] sm:$0xff]  ;;  %v1336_v22 = vld [vmem:[#allocation6 + $0x18] sm:$0xff]  ;;  %v1335_v23 = vld [vmem:[#allocation6 + $0x10] sm:$0xff]  ;;  %s463_s23 = scalar_lea.vmem %s1899_s10, %s1322_s4 }
  0x33   : > { %v466_v5 = vld [vmem:[%s459_s24] sm:$0xff]  ;;  %v1334_v24 = vld [vmem:[#allocation6 + $0x8] sm:$0xff]  ;;  %v1333_v25 = vld [vmem:[#allocation6] sm:$0xff]  ;;  %s1373_s4 = sshll.u32 %s1748_s0, 4  ;;  %s957_s0 = scalar_lea.sflag [#allocation5], %s452_s13 }
  0x34   : > { %v493_v8 = vunpack.c.h.b16 %v466_v5  ;;  %664 = vmatpush.bf16.msra.mxu2 %v1339_v11  ;;  %v492_v19 = vunpack.c.l.b16 %v466_v5  ;;  %v1247_v26 = vld [vmem:[#allocation8 + $0x70] sm:$0xf]  ;;  %v1356_v27 = vld [vmem:[#allocation8 + $0x74] sm:$0xf0]  ;;  %v1355_v28 = vld [vmem:[#allocation8 + $0x74] sm:$0xf]  ;;  %s971_s24 = scalar_lea.hbm %s1900_s11, %s1373_s4 }
  0x35   : > { %v1248_v29 = vor.u32 %v1356_v27, %v1247_v26  ;;  %v1249_v30 = vld [vmem:[#allocation8 + $0x78] sm:$0xf0]  ;;  %v1239_v31 = vld [vmem:[#allocation8 + $0x60] sm:$0xf]  ;;  %v1354_v32 = vld [vmem:[#allocation8 + $0x64] sm:$0xf0] }
  0x36   : > { %v495_v12 = vpack.c.b16 %v493_v8, %v493_v8  ;;  %566 = vmatpush.bf16.msra.mxu0 %v1328_v9  ;;  %584 = vmatpush.bf16.msra.mxu1 %v1331_v10  ;;  %v494_v21 = vpack.c.b16 %v492_v19, %v492_v19  ;;  %v1252_v34 = vor.u32 %v1355_v28, %v1249_v30  ;;  %v1353_v35 = vld [vmem:[#allocation8 + $0x64] sm:$0xf]  ;;  %v1241_v36 = vld [vmem:[#allocation8 + $0x68] sm:$0xf0]  ;;  %v1231_v39 = vld [vmem:[#allocation8 + $0x50] sm:$0xf]  ;;  %v1835_v3 = vstv %s465_s27 }
  0x37   : > { %782 = vmatpush.bf16.msra.mxu3 %v1248_v29  ;;  %v1240_v37 = vor.u32 %v1354_v32, %v1239_v31  ;;  %v1244_v38 = vor.u32 %v1353_v35, %v1241_v36  ;;  %v1352_v40 = vld [vmem:[#allocation8 + $0x54] sm:$0xf0]  ;;  %v1351_v41 = vld [vmem:[#allocation8 + $0x54] sm:$0xf]  ;;  %v1233_v42 = vld [vmem:[#allocation8 + $0x58] sm:$0xf0] }
  0x38   : > { %665 = vmatpush.bf16.msra.mxu2 %v1338_v14  ;;  %v1232_v43 = vor.u32 %v1352_v40, %v1231_v39  ;;  %v1236_v44 = vor.u32 %v1351_v41, %v1233_v42  ;;  %v1223_v45 = vld [vmem:[#allocation8 + $0x40] sm:$0xf]  ;;  %v1350_v46 = vld [vmem:[#allocation8 + $0x44] sm:$0xf0]  ;;  %v1349_v47 = vld [vmem:[#allocation8 + $0x44] sm:$0xf] }
  0x39   : > { %1156 = vmatmul.msk.bf16.vlgmr.msra.gmra.mxu1 %vm556_vm1, %v495_v12  ;;  %v1225_v48 = vld [vmem:[#allocation8 + $0x48] sm:$0xf0]  ;;  %v1224_v50 = vor.u32 %v1350_v46, %v1223_v45  ;;  %v1215_v52 = vld [vmem:[#allocation8 + $0x30] sm:$0xf]  ;;  %v1348_v53 = vld [vmem:[#allocation8 + $0x34] sm:$0xf0] }
  0x3a   : > { %567 = vmatpush.bf16.msra.mxu0 %v1327_v13  ;;  %795 = vmatpush.bf16.msrb.mxu1 %v1252_v34  ;;  %v1228_v51 = vor.u32 %v1349_v47, %v1225_v48  ;;  %v1347_v54 = vld [vmem:[#allocation8 + $0x34] sm:$0xf]  ;;  %v1217_v55 = vld [vmem:[#allocation8 + $0x38] sm:$0xf0]  ;;  %v1216_v56 = vor.u32 %v1348_v53, %v1215_v52  ;;  %v1207_v58 = vld [vmem:[#allocation8 + $0x20] sm:$0xf] }
  0x3b   : > { %783 = vmatpush.bf16.msra.mxu3 %v1240_v37  ;;  %v1220_v57 = vor.u32 %v1347_v54, %v1217_v55  ;;  %v1346_v59 = vld [vmem:[#allocation8 + $0x24] sm:$0xf0]  ;;  %v1345_v60 = vld [vmem:[#allocation8 + $0x24] sm:$0xf]  ;;  %v1209_v61 = vld [vmem:[#allocation8 + $0x28] sm:$0xf0] }
  0x3c   : > { %666 = vmatpush.bf16.msra.mxu2 %v1337_v16  ;;  %v1458_v62 = vld [vmem:[%s1892_s3] ss:$0 sm:$0xff]  ;;  %v1208_v63 = vor.u32 %v1346_v59, %v1207_v58  ;;  %v1212_v0 = vor.u32 %v1345_v60, %v1209_v61  ;;  %v1344_v10 = vld [vmem:[#allocation8 + $0x14] sm:$0xf0]  ;;  %v1343_v11 = vld [vmem:[#allocation8 + $0x14] sm:$0xf] }
  0x3d   : > { %v1199_v9 = vld [vmem:[#allocation8 + $0x10] sm:$0xf]  ;;  %v1201_v13 = vld [vmem:[#allocation8 + $0x18] sm:$0xf0]  ;;  %v1342_v16 = vld [vmem:[#allocation8 + $0x4] sm:$0xf0] }
  0x3e   : > { %568 = vmatpush.bf16.msra.mxu0 %v1326_v15  ;;  %796 = vmatpush.bf16.msrb.mxu1 %v1244_v38  ;;  %v1200_v12 = vor.u32 %v1344_v10, %v1199_v9  ;;  %v1204_v14 = vor.u32 %v1343_v11, %v1201_v13  ;;  %v1191_v15 = vld [vmem:[#allocation8] sm:$0xf]  ;;  %v1193_v19 = vld [vmem:[#allocation8 + $0x8] sm:$0xf0]  ;;  %v1370_v27 = vld [vmem:[#allocation9 + $0x64] sm:$0xf0] }
  0x3f   : > { %784 = vmatpush.bf16.msra.mxu3 %v1232_v43  ;;  %v1303_v26 = vld [vmem:[#allocation9 + $0x60] sm:$0xf]  ;;  %v1369_v29 = vld [vmem:[#allocation9 + $0x64] sm:$0xf]  ;;  %v1305_v30 = vld [vmem:[#allocation9 + $0x68] sm:$0xf0] }
  0x40   : > { %667 = vmatpush.bf16.msra.mxu2 %v1336_v22  ;;  %v1372_v22 = vld [vmem:[#allocation9 + $0x74] sm:$0xf0]  ;;  %v1304_v31 = vor.u32 %v1370_v27, %v1303_v26  ;;  %v1308_v32 = vor.u32 %v1369_v29, %v1305_v30  ;;  %v1367_v35 = vld [vmem:[#allocation9 + $0x54] sm:$0xf]  ;;  %v1297_v36 = vld [vmem:[#allocation9 + $0x58] sm:$0xf0] }
  0x41   : > { %v1368_v34 = vld [vmem:[#allocation9 + $0x54] sm:$0xf0]  ;;  %v1300_v38 = vor.u32 %v1367_v35, %v1297_v36  ;;  %v1287_v39 = vld [vmem:[#allocation9 + $0x40] sm:$0xf]  ;;  %v1366_v40 = vld [vmem:[#allocation9 + $0x44] sm:$0xf0] }
  0x42   : > { %569 = vmatpush.bf16.msra.mxu0 %v1325_v17  ;;  %797 = vmatpush.bf16.msrb.mxu1 %v1236_v44  ;;  %v1341_v17 = vld [vmem:[#allocation8 + $0x4] sm:$0xf]  ;;  %v1289_v42 = vld [vmem:[#allocation9 + $0x48] sm:$0xf0]  ;;  %v1288_v43 = vor.u32 %v1366_v40, %v1287_v39  ;;  %v1279_v45 = vld [vmem:[#allocation9 + $0x30] sm:$0xf] }
  0x43   : > { %785 = vmatpush.bf16.msra.mxu3 %v1224_v50  ;;  %v1365_v41 = vld [vmem:[#allocation9 + $0x44] sm:$0xf]  ;;  %v1364_v46 = vld [vmem:[#allocation9 + $0x34] sm:$0xf0]  ;;  %v1363_v47 = vld [vmem:[#allocation9 + $0x34] sm:$0xf] }
  0x44   : > { %668 = vmatpush.bf16.msra.mxu2 %v1335_v23  ;;  %v1371_v23 = vld [vmem:[#allocation9 + $0x74] sm:$0xf]  ;;  %v1292_v44 = vor.u32 %v1365_v41, %v1289_v42  ;;  %v1281_v48 = vld [vmem:[#allocation9 + $0x38] sm:$0xf0]  ;;  %v1271_v58 = vld [vmem:[#allocation9 + $0x20] sm:$0xf] }
  0x45   : > { %v1284_v50 = vor.u32 %v1363_v47, %v1281_v48  ;;  %v1362_v59 = vld [vmem:[#allocation9 + $0x24] sm:$0xf0]  ;;  %v1361_v60 = vld [vmem:[#allocation9 + $0x24] sm:$0xf]  ;;  %v1257_v11 = vld [vmem:[#allocation9 + $0x8] sm:$0xf0] }
  0x46   : > { %570 = vmatpush.bf16.msra.mxu0 %v1324_v18  ;;  %798 = vmatpush.bf16.msrb.mxu1 %v1228_v51  ;;  %v1192_v18 = vor.u32 %v1342_v16, %v1191_v15  ;;  %v1459_v51 = vld [vmem:[%s1894_s5] ss:$0 sm:$0xff]  ;;  %v1272_v61 = vor.u32 %v1362_v59, %v1271_v58  ;;  %v1357_v9 = vld [vmem:[#allocation9 + $0x4] sm:$0xf]  ;;  %s454_s27 = scalar_lea.vmem [#allocation11], %s1112_s2  ;;  %s975_s30 = sshll.u32 %s971_s24, 4  ;;  %s976_s30 = int_to_ptr.hbm [resolvable:$true] %s975_s30 }
  0x47   : > { %786 = vmatpush.bf16.msra.mxu3 %v1216_v56  ;;  %v696_v13 = vld [vmem:[%s1896_s7] sm:$0x3]  ;;  %s973_s29 = sshll.u32 %s454_s27, 4  ;;  %s1594_s17 = sshra.s32 %s976_s30, 4  ;;  %s974_s29 = int_to_ptr.vmem [resolvable:$true] %s973_s29  ;;  %s1595_s17 = int_to_ptr.hbm [resolvable:$true] %s1594_s17 }
  0x48   : > { %669 = vmatpush.bf16.msra.mxu2 %v1334_v24  ;;  %v832_v27 = vld [vmem:[%s1898_s9] sm:$0x3]  ;;  %s1596_s18 = scalar_lea.hbm %s1595_s17, 16  ;;  %s1600_s15 = scalar_lea.hbm %s1900_s11, 32 }
  0x49   : > { %p1597_p0 = scmp.ne.s32.totalorder %s1595_s17, %s1596_s18  ;;  %p1601_p3 = scmp.lt.s32.totalorder %s1595_s17, %s1900_s11 }
  0x4a   : > { %571 = vmatpush.bf16.msra.mxu0 %v1323_v20  ;;  %799 = vmatpush.bf16.msrb.mxu1 %v1220_v57  ;;  %v1196_v20 = vor.u32 %v1341_v17, %v1193_v19  ;;  %p1602_p4 = scmp.lt.s32.totalorder %s1600_s15, %s1596_s18 }
  0x4b   : > { %787 = vmatpush.bf16.msra.mxu3 %v1208_v63  ;;  %p1598_p1 = pnand %p1597_p0, %p1765_p5 }
  0x4c   : > { %670 = vmatpush.bf16.msra.mxu2 %v1333_v25  ;;  %v1313_v25 = vld [vmem:[#allocation9 + $0x78] sm:$0xf0]  ;;  %p1603_p7 = por %p1602_p4, %p1601_p3 }
  0x4d   : > { %572 = vmatmul.bf16.vlgmr.msra.gmra.mxu0 %v494_v21  ;;  %v1311_v21 = vld [vmem:[#allocation9 + $0x70] sm:$0xf]  ;;  %v1316_v28 = vor.u32 %v1371_v23, %v1313_v25  ;;  %p1599_p2 = pneg %p1598_p1 }
  0x4e   : > { %800 = vmatpush.bf16.msrb.mxu1 %v1212_v0  ;;  %v1312_v24 = vor.u32 %v1372_v22, %v1311_v21  ;;  %v1263_v0 = vld [vmem:[#allocation9 + $0x10] sm:$0xf] }
  0x4f   : > { %788 = vmatpush.bf16.msra.mxu3 %v1200_v12  ;;  %v1260_v12 = vor.u32 %v1357_v9, %v1257_v11  ;;  %p1604_p8 = pnand %p1603_p7, %p1599_p2 }
  0x50   : > { %918 = vmatpush.bf16.msrb.mxu0 %v1312_v24  ;;  %931 = vmatpush.bf16.msrb.mxu2 %v1316_v28  ;;  %v834_v28 = vperm.slane %v832_v27, 0 }
  0x52   : > { %801 = vmatpush.bf16.msrb.mxu1 %v1204_v14  ;;  %v699_v14 = vperm.slane %v696_v13, 1 }
  0x53   : > { %789 = vmatpush.bf16.msra.mxu3 %v1192_v18  ;;  %v698_v18 = vperm.slane %v696_v13, 0 }
  0x54   : > { %919 = vmatpush.bf16.msrb.mxu0 %v1304_v31  ;;  %932 = vmatpush.bf16.msrb.mxu2 %v1308_v32  ;;  %v835_v32 = vperm.slane %v832_v27, 1 }
  0x56   : > { %802 = vmatpush.bf16.msrb.mxu1 %v1196_v20 }
  0x58   : > { %933 = vmatpush.bf16.msrb.mxu2 %v1300_v38 }
  0x5c   : > { %934 = vmatpush.bf16.msrb.mxu2 %v1292_v44 }
  0x60   : > { %935 = vmatpush.bf16.msrb.mxu2 %v1284_v50 }
  0xb6   : > { %v586_v33 = vpop.f32.mrf.mxu1 }
  0xbe   : > { %v588_v49 = vpop.f32.mrf.mxu1 }
  0xbf   : > { %v1280_v49 = vor.u32 %v1364_v46, %v1279_v45 }
  0xca   : > { %v573_v1 = vpop.f32.mrf.mxu0 }
  0xcb   : > { %v574_v2 = vadd.f32 %v1458_v62, %v573_v1  ;;  %v1273_v62 = vld [vmem:[#allocation9 + $0x28] sm:$0xf0]  ;;  %v1360_v1 = vld [vmem:[#allocation9 + $0x14] sm:$0xf0] }
  0xcc   : > { %v1276_v63 = vor.u32 %v1361_v60, %v1273_v62 }
  0xcd   : > { %v587_v4 = vadd.f32 %v586_v33, %v574_v2  ;;  %v1295_v33 = vld [vmem:[#allocation9 + $0x50] sm:$0xf]  ;;  %v1359_v2 = vld [vmem:[#allocation9 + $0x14] sm:$0xf] }
  0xce   : > { %v1296_v37 = vor.u32 %v1368_v34, %v1295_v33  ;;  %936 = vmatpush.bf16.msrb.mxu2 %v1276_v63 }
  0xcf   : > { %vm590_vm2 = vcmp.ge.f32.partialorder %v587_v4, 0.0  ;;  %v592_v5 = vmul.f32 %v1835_v3, %v587_v4 }
  0xd0   : > { %920 = vmatpush.bf16.msrb.mxu0 %v1296_v37 }
  0xd1   : > { %v593_v6 = vsel %vm590_vm2, %v587_v4, %v592_v5  ;;  %v1264_v4 = vor.u32 %v1360_v1, %v1263_v0  ;;  %v1265_v5 = vld [vmem:[#allocation9 + $0x18] sm:$0xf0] }
  0xd2   : > { %v575_v7 = vpop.f32.mrf.mxu0  ;;  %v594_v8 = vpack.c.bf16 %v593_v6, %v593_v6  ;;  %v1268_v6 = vor.u32 %v1359_v2, %v1265_v5 }
  0xd3   : > { %v1255_v7 = vld [vmem:[#allocation9] sm:$0xf] }
  0xd4   : > { %671 = vmatmul.bf16.vlgmr.msra.gmra.mxu2 %v594_v8  ;;  %921 = vmatpush.bf16.msrb.mxu0 %v1288_v43  ;;  %v1358_v8 = vld [vmem:[#allocation9 + $0x4] sm:$0xf0] }
  0xd5   : > { %937 = vmatpush.bf16.msrb.mxu2 %v1268_v6  ;;  %v1256_v10 = vor.u32 %v1358_v8, %v1255_v7 }
  0xd8   : > { %922 = vmatpush.bf16.msrb.mxu0 %v1280_v49 }
  0xd9   : > { %938 = vmatpush.bf16.msrb.mxu2 %v1260_v12 }
  0xdc   : > { %923 = vmatpush.bf16.msrb.mxu0 %v1272_v61 }
  0xe0   : > { %924 = vmatpush.bf16.msrb.mxu0 %v1264_v4 }
  0xe4   : > { %925 = vmatpush.bf16.msrb.mxu0 %v1256_v10 }
 0x157   : > { %v672_v52 = vpop.f32.mrf.mxu2 }
 0x158   : > { %v673_v53 = vadd.f32 %v1459_v51, %v672_v52 }
 0x15a   : > { %v677_v54 = vmul.f32 %v673_v53, %v1835_v3  ;;  %vm676_vm3 = vcmp.ge.f32.partialorder %v673_v53, 0.0 }
 0x15c   : > { %v678_v55 = vsel %vm676_vm3, %v673_v53, %v677_v54 }
 0x15d   : > { %v679_v56 = vpack.c.bf16 %v678_v55, %v678_v55 }
 0x15f   : > { %v674_v57 = vpop.f32.mrf.mxu2  ;;  %790 = vmatmul.bf16.vlgmr.msra.gmra.mxu3 %v679_v56  ;;  %803 = vmatmul.bf16.vlgmr.msrb.gmra.mxu1 %v679_v56 }
 0x1dc   : > { %v804_v15 = vpop.f32.mrf.mxu1 }
 0x1dd   : > { %v805_v16 = vadd.f32 %v804_v15, %v699_v14 }
 0x1df   : > { %vm809_vm4 = vcmp.ge.f32.partialorder %v805_v16, 0.0  ;;  %v811_v17 = vmul.f32 %v805_v16, %v1835_v3 }
 0x1e1   : > { %v813_v19 = vsel %vm809_vm4, %v805_v16, %v811_v17 }
 0x1e2   : > { %814 = vst [vmem:[%s463_s23] sm:$0xff] %v813_v19  ;;  %v791_v20 = vpop.f32.mrf.mxu3 }
 0x1e3   : > { %v792_v21 = vadd.f32 %v791_v20, %v698_v18 }
 0x1e4   : > { %v806_v22 = vpop.f32.mrf.mxu1 }
 0x1e5   : > { %vm808_vm5 = vcmp.ge.f32.partialorder %v792_v21, 0.0  ;;  %v810_v23 = vmul.f32 %v792_v21, %v1835_v3 }
 0x1e7   : > { %v812_v24 = vsel %vm808_vm5, %v792_v21, %v810_v23 }
 0x1e8   : > { %v815_v25 = vpack.c.bf16 %v812_v24, %v812_v24 }
 0x1ea   : > { %v793_v26 = vpop.f32.mrf.mxu3  ;;  %926 = vmatmul.bf16.vlgmr.msrb.gmra.mxu0 %v815_v25  ;;  %939 = vmatmul.bf16.vlgmr.msrb.gmra.mxu2 %v815_v25 }
 0x267   : > { %v927_v29 = vpop.f32.mrf.mxu0 }
 0x268   : > { %v928_v30 = vadd.f32 %v927_v29, %v834_v28 }
 0x26a   : > { %vm944_vm6 = vcmp.ge.f32.partialorder %v928_v30, 0.0  ;;  %v946_v31 = vmul.f32 %v928_v30, %v1835_v3 }
 0x26c   : > { %v948_v33 = vsel %vm944_vm6, %v928_v30, %v946_v31 }
 0x26d   : > { %950 = vst [vmem:[%s454_s27] sm:$0xff] %v948_v33  ;;  %v940_v34 = vpop.f32.mrf.mxu2 }
 0x26e   : > { %v941_v35 = vadd.f32 %v940_v34, %v835_v32 }
 0x26f   : > { %v929_v36 = vpop.f32.mrf.mxu0 }
 0x270   : > { %vm945_vm7 = vcmp.ge.f32.partialorder %v941_v35, 0.0  ;;  %v947_v37 = vmul.f32 %v941_v35, %v1835_v3 }
 0x272   : > { %v949_v38 = vsel %vm945_vm7, %v941_v35, %v947_v37 }
 0x273   : > { %951 = vst [vmem:[%s454_s27 + $0x8] sm:$0xff] %v949_v38 }
 0x274   : > { %1607 = shalt.err (!%p1604_p8)
}
 0x275   : > { %1390 = dma.vmem_to_hbm [thread:$0]  (%p1765_p5), %s974_s29, 256, %s976_s30, %s957_s0   ;;  %v942_v3 = vpop.f32.mrf.mxu2 }
 0x276 PF: > { %s1919_s14 = sld [smem:[#allocation16_spill]]  ;;  %p1417_p9 = scmp.ge.s32.totalorder %s1654_s22, 2 }
 0x278   : > { %p1406_p10 = pnand %p1417_p9, %p1769_p6 }
 0x27a   : > { %p1407_p11 = pneg %p1406_p10 }
 0x27c   : > { %s994_s13 = sand.u32 1, %s1919_s14  }
 0x27d   : > { %s995_s2 = scalar_lea.sflag [#allocation5], %s994_s13 }
 0x27e   : > { %1637 = dma.done.wait (%p1407_p11), %s995_s2, 256  }
 0x27f   : > { %1639 = vsyncadd (%p1407_p11), %s995_s2, 4294967040  ;;  %s1921_s22 = sld [smem:[#allocation18_spill]]  ;;  %s1924_s19 = smov %s1646_s20 }
 0x280   : > { %s1922_s4 = sld [smem:[#allocation17_spill]] }
 0x281   : > { %s1923_s21 = sld [smem:[#allocation19_spill]] }
 0x285   : > { %p26_p12 = scmp.ge.s32.totalorder %s1921_s22, 4  }
 0x286   : > { %s1925_s20 = smov %s1922_s4 }
 0x287   :  { %28 = sbr.rel (!%p26_p12) target bundleno = 10 (0xa), region = 124 }
 0x28c   :  { %1001 = vsyncpa [#allocation4], 1 }
 0x28d   :  { %1003 = vsyncpa [#allocation4 + $0x1], 1 }
 0x28e   :  { %1004 = vsyncpa [#allocation7], 1 }
 0x28f   :  { %1005 = vsyncpa [#allocation10], 1 }
 0x290   :  { %1006 = vsyncpa [#allocation5], 1 }
 0x291   :  { %1008 = vsyncpa [#allocation5 + $0x1], 1 }

</bundles_post_ra>
